<compile_context>
chip_gen: v6e
topology: v6e:2x2x1
jax: 0.10.0
libtpu: 0.0.40
codegen_flags: <defaults>
</compile_context>

<pallas_src>
import jax
import jax.numpy as jnp
from jax.experimental import pallas as pl
from jax.experimental.pallas import tpu as pltpu


def _gelu_exact(x):
    # matches torch.nn.GELU() default (erf formulation)
    return 0.5 * x * (1.0 + jax.lax.erf(x * (1.0 / jnp.sqrt(2.0).astype(x.dtype))))


def _round_up(a, b):
    return (a + b - 1) // b * b


def kaggle_kernel(x_ref, w1_ref, b1_ref, w2_ref, b2_ref, out_ref):
    # x_ref: (TILE_M, C)   w1_ref: (C, H)   w2_ref: (H, O)   out_ref: (TILE_M, O)
    x = x_ref[...]
    h = jnp.dot(x, w1_ref[...], preferred_element_type=jnp.float32) + b1_ref[...]
    h = _gelu_exact(h)
    h = h.astype(w2_ref.dtype)
    o = jnp.dot(h, w2_ref[...], preferred_element_type=jnp.float32) + b2_ref[...]
    o = _gelu_exact(o)
    out_ref[...] = o.astype(out_ref.dtype)


def kaggle_forward(x, params, *, tile_m=512, compute_dtype=jnp.float32):
    """x: (B, N, C) float32. Returns PyTorch-equivalent output of kaggle.forward
    (pred=True, eval semantics)."""
    B, N, C = x.shape
    H = params["w1"].shape[1]          # hidden_features
    O = params["w2"].shape[1]          # 256 (pred=True)

    # ---- host-side weight prep: fold v-projection + residual into fc1 ----
    eye = jnp.eye(C, dtype=jnp.float32)
    w1p = (params["wv"] + eye) @ params["w1"]          # (C, H)
    b1p = params["bv"] @ params["w1"] + params["b1"]   # (1, H)
    w2, b2 = params["w2"], params["b2"]

    # Optional low-precision MXU inputs (f32 accumulation stays in-kernel).
    w1p_c = w1p.astype(compute_dtype)
    w2_c = w2.astype(compute_dtype)

    # ---- tiling over the fused row dim M = B*N ----
    M = B * N
    tm = min(int(tile_m), _round_up(M, 8))             # multiple of 8 sublanes
    m_pad = _round_up(M, tm)
    x2d = x.reshape(M, C).astype(compute_dtype)
    if m_pad != M:
        x2d = jnp.pad(x2d, ((0, m_pad - M), (0, 0)))
    grid = (m_pad // tm,)

    cost = pl.CostEstimate(
        flops=2 * M * (C * H + H * O),
        transcendentals=M * (H + O),
        bytes_accessed=M * (C + O) * 4 + (C * H + H + H * O + O) * 4,
    )

    out2d = pl.pallas_call(
        kaggle_kernel,
        out_shape=jax.ShapeDtypeStruct((m_pad, O), jnp.float32),
        grid=grid,
        in_specs=[
            pl.BlockSpec((tm, C), lambda i: (i, 0)),    # x tile, streams over M
            pl.BlockSpec((C, H), lambda i: (0, 0)),     # fused fc1 weight, resident
            pl.BlockSpec((1, H), lambda i: (0, 0)),     # fused fc1 bias, resident
            pl.BlockSpec((H, O), lambda i: (0, 0)),     # fc2 weight, resident
            pl.BlockSpec((1, O), lambda i: (0, 0)),     # fc2 bias, resident
        ],
        out_specs=pl.BlockSpec((tm, O), lambda i: (i, 0)),
        compiler_params=pltpu.CompilerParams(
            dimension_semantics=("parallel",),          # shard rows across TCs (v7x)
            vmem_limit_bytes=32 * 1024 * 1024,          # fits v5e/v6e/v7x scoped VMEM
        ),
        cost_estimate=cost,
    )(x2d, w1p_c, b1p, w2_c, b2)

    out = out2d[:M].reshape(B, N, O)
    # PyTorch x.squeeze(0): removes dim 0 only if it equals 1
    if out.shape[0] == 1:
        out = out[0]
    return out


def init_params(key, in_features, hidden_features=256, out_features=256):
    ks = jax.random.split(key, 10)
    mk = lambda k, shp: (0.02 * jax.random.normal(k, shp, dtype=jnp.float32))
    return {
        # weights stored as (in, out) — i.e. transposed vs torch's (out, in)
        # wq/bq/wk/bk exist in the module but do not affect the forward output
        # (softmax over a singleton axis is exactly 1), so the kernel skips them.
        "wq": mk(ks[0], (in_features, in_features)),
        "bq": mk(ks[1], (1, in_features)),
        "wk": mk(ks[2], (in_features, in_features)),
        "bk": mk(ks[3], (1, in_features)),
        "wv": mk(ks[4], (in_features, in_features)),
        "bv": mk(ks[5], (1, in_features)),
        "w1": mk(ks[6], (in_features, hidden_features)),
        "b1": mk(ks[7], (1, hidden_features)),
        "w2": mk(ks[8], (hidden_features, out_features)),
        "b2": mk(ks[9], (1, out_features)),
    }


def reference_forward(x, p):
    # pure-JAX reference mirroring the PyTorch module faithfully,
    # INCLUDING the q/k projections and singleton softmax (dropout unused).
    q = x @ p["wq"] + p["bq"]
    k = x @ p["wk"] + p["bk"]
    v = x @ p["wv"] + p["bv"]
    logits = jnp.sum(q * k, axis=-1, keepdims=True)              # (B,N,1)
    attn = jax.nn.softmax(logits[..., None], axis=-1)[..., 0]    # exactly ones
    y = attn * v + x
    h = _gelu_exact(y @ p["w1"] + p["b1"])
    o = _gelu_exact(h @ p["w2"] + p["b2"])
    return o[0] if o.shape[0] == 1 else o


if __name__ == "__main__":
    B, N, C = 2, 8, 32           # batch, seq, in_features
    key = jax.random.PRNGKey(0)
    kx, kp = jax.random.split(key)
    x = jax.random.normal(kx, (B, N, C), dtype=jnp.float32)
    params = init_params(kp, in_features=C, hidden_features=256, out_features=256)

    # f32 compute for parity with torch defaults; pass compute_dtype=jnp.bfloat16
    # on v6e/v7x for MXU-peak throughput (accepting ~1e-3 drift).
    out = kaggle_forward(x, params, tile_m=512, compute_dtype=jnp.float32)
    out = jax.block_until_ready(out)

    ref = reference_forward(x, params)
    assert out.shape == ref.shape == (B, N, 256)
    # 1e-4 tolerance: the (Wv + I) @ W1 host-side folding reassociates f32 ops.
    assert jnp.allclose(out, ref, atol=1e-4, rtol=1e-4), "mismatch vs JAX reference"

    print("KERNEL_OK")
</pallas_src>

<mosaic_0001>
module attributes {stable_mosaic.version = 11 : i64} {
  func.func @kaggle_kernel(%arg0: i32, %arg1: memref<16x32xf32, #tpu.memory_space<vmem>>, %arg2: memref<32x256xf32, #tpu.memory_space<vmem>>, %arg3: memref<1x256xf32, #tpu.memory_space<vmem>>, %arg4: memref<256x256xf32, #tpu.memory_space<vmem>>, %arg5: memref<1x256xf32, #tpu.memory_space<vmem>>, %arg6: memref<16x256xf32, #tpu.memory_space<vmem>>) attributes {dimension_semantics = [#tpu.dimension_semantics<parallel>], iteration_bounds = array<i64: 1>, scalar_prefetch = 0 : i64, scratch_operands = 0 : i64, tpu.core_type = #tpu.core_type<tc>, window_params = [{transform_indices = @transform_0, window_bounds = array<i64: 16, 32>}, {pipeline_mode = #tpu.pipeline_mode<synchronous>, transform_indices = @transform_1, window_bounds = array<i64: 32, 256>}, {pipeline_mode = #tpu.pipeline_mode<synchronous>, transform_indices = @transform_2, window_bounds = array<i64: 1, 256>}, {pipeline_mode = #tpu.pipeline_mode<synchronous>, transform_indices = @transform_3, window_bounds = array<i64: 256, 256>}, {pipeline_mode = #tpu.pipeline_mode<synchronous>, transform_indices = @transform_4, window_bounds = array<i64: 1, 256>}, {transform_indices = @transform_5, window_bounds = array<i64: 16, 256>}]} {
    %c0 = arith.constant 0 : index
    %c0_0 = arith.constant 0 : index
    %0 = vector.load %arg1[%c0, %c0_0] : memref<16x32xf32, #tpu.memory_space<vmem>>, vector<16x32xf32>
    %c0_1 = arith.constant 0 : index
    %c0_2 = arith.constant 0 : index
    %1 = vector.load %arg2[%c0_1, %c0_2] : memref<32x256xf32, #tpu.memory_space<vmem>>, vector<32x256xf32>
    %cst = arith.constant dense<0.000000e+00> : vector<16x256xf32>
    %2 = tpu.matmul %0, %1, %cst {dimension_numbers = #tpu.dot_dimension_numbers<[1], [0], [0], [1], [0, 0, 1, 1], [], []>} : vector<16x32xf32>, vector<32x256xf32>, vector<16x256xf32> -> vector<16x256xf32>
    %c0_3 = arith.constant 0 : index
    %c0_4 = arith.constant 0 : index
    %3 = vector.load %arg3[%c0_3, %c0_4] : memref<1x256xf32, #tpu.memory_space<vmem>>, vector<1x256xf32>
    %4 = vector.broadcast %3 : vector<1x256xf32> to vector<16x256xf32>
    %5 = arith.addf %2, %4 : vector<16x256xf32>
    %cst_5 = arith.constant 5.000000e-01 : f32
    %6 = vector.broadcast %cst_5 : f32 to vector<16x256xf32>
    %7 = arith.mulf %6, %5 : vector<16x256xf32>
    %cst_6 = arith.constant 2.000000e+00 : f32
    %8 = math.sqrt %cst_6 : f32
    %cst_7 = arith.constant 1.000000e+00 : f32
    %9 = arith.divf %cst_7, %8 : f32
    %10 = vector.broadcast %9 : f32 to vector<16x256xf32>
    %11 = arith.mulf %5, %10 : vector<16x256xf32>
    %12 = math.erf %11 : vector<16x256xf32>
    %cst_8 = arith.constant 1.000000e+00 : f32
    %13 = vector.broadcast %cst_8 : f32 to vector<16x256xf32>
    %14 = arith.addf %13, %12 : vector<16x256xf32>
    %15 = arith.mulf %7, %14 : vector<16x256xf32>
    %c0_9 = arith.constant 0 : index
    %c0_10 = arith.constant 0 : index
    %16 = vector.load %arg4[%c0_9, %c0_10] : memref<256x256xf32, #tpu.memory_space<vmem>>, vector<256x256xf32>
    %cst_11 = arith.constant dense<0.000000e+00> : vector<16x256xf32>
    %17 = tpu.matmul %15, %16, %cst_11 {dimension_numbers = #tpu.dot_dimension_numbers<[1], [0], [0], [1], [0, 0, 1, 1], [], []>} : vector<16x256xf32>, vector<256x256xf32>, vector<16x256xf32> -> vector<16x256xf32>
    %c0_12 = arith.constant 0 : index
    %c0_13 = arith.constant 0 : index
    %18 = vector.load %arg5[%c0_12, %c0_13] : memref<1x256xf32, #tpu.memory_space<vmem>>, vector<1x256xf32>
    %19 = vector.broadcast %18 : vector<1x256xf32> to vector<16x256xf32>
    %20 = arith.addf %17, %19 : vector<16x256xf32>
    %cst_14 = arith.constant 5.000000e-01 : f32
    %21 = vector.broadcast %cst_14 : f32 to vector<16x256xf32>
    %22 = arith.mulf %21, %20 : vector<16x256xf32>
    %cst_15 = arith.constant 2.000000e+00 : f32
    %23 = math.sqrt %cst_15 : f32
    %cst_16 = arith.constant 1.000000e+00 : f32
    %24 = arith.divf %cst_16, %23 : f32
    %25 = vector.broadcast %24 : f32 to vector<16x256xf32>
    %26 = arith.mulf %20, %25 : vector<16x256xf32>
    %27 = math.erf %26 : vector<16x256xf32>
    %cst_17 = arith.constant 1.000000e+00 : f32
    %28 = vector.broadcast %cst_17 : f32 to vector<16x256xf32>
    %29 = arith.addf %28, %27 : vector<16x256xf32>
    %30 = arith.mulf %22, %29 : vector<16x256xf32>
    %c0_18 = arith.constant 0 : index
    %c0_19 = arith.constant 0 : index
    %31 = vector.load %arg6[%c0_18, %c0_19] : memref<16x256xf32, #tpu.memory_space<vmem>>, vector<16x256xf32>
    tpu.vector_store %arg6[%c0_18, %c0_19], %30 {strides = array<i32>} : memref<16x256xf32, #tpu.memory_space<vmem>>, vector<16x256xf32>,
    return
  }
  func.func @transform_0(%arg0: i32) -> (i32, i32) {
    %c0_i32 = arith.constant 0 : i32
    %c0_i32_0 = arith.constant 0 : i32
    return %arg0, %c0_i32 : i32, i32
  }
  func.func @transform_1(%arg0: i32) -> (i32, i32) {
    %c0_i32 = arith.constant 0 : i32
    %c0_i32_0 = arith.constant 0 : i32
    %c0_i32_1 = arith.constant 0 : i32
    return %c0_i32, %c0_i32_0 : i32, i32
  }
  func.func @transform_2(%arg0: i32) -> (i32, i32) {
    %c0_i32 = arith.constant 0 : i32
    %c0_i32_0 = arith.constant 0 : i32
    %c0_i32_1 = arith.constant 0 : i32
    return %c0_i32, %c0_i32_0 : i32, i32
  }
  func.func @transform_3(%arg0: i32) -> (i32, i32) {
    %c0_i32 = arith.constant 0 : i32
    %c0_i32_0 = arith.constant 0 : i32
    %c0_i32_1 = arith.constant 0 : i32
    return %c0_i32, %c0_i32_0 : i32, i32
  }
  func.func @transform_4(%arg0: i32) -> (i32, i32) {
    %c0_i32 = arith.constant 0 : i32
    %c0_i32_0 = arith.constant 0 : i32
    %c0_i32_1 = arith.constant 0 : i32
    return %c0_i32, %c0_i32_0 : i32, i32
  }
  func.func @transform_5(%arg0: i32) -> (i32, i32) {
    %c0_i32 = arith.constant 0 : i32
    %c0_i32_0 = arith.constant 0 : i32
    return %arg0, %c0_i32 : i32, i32
  }
}

</mosaic_0001>

<bundles_post_ra>
// kernel: tpu_custom_call.1
= control target key start
LH: loop header
LB: loop body
LE: loop exit
PB: predicated region body
PF: predicated region fallthrough
CT: control target
= control target key end

     0   :  { %10 = vsyncpa [#allocation3], 0  ;;  %s564_s0 = inlined_call_operand.hbm [shape: f32[16,32], index: 0, kind: input, shape index: {}]   ;;  %s565_s1 = inlined_call_operand.hbm [shape: f32[32,256], index: 1, kind: input, shape index: {}]   ;;  %s566_s2 = inlined_call_operand.vmem [shape: f32[1,256], index: 2, kind: input, shape index: {}]   ;;  %s567_s3 = inlined_call_operand.hbm [shape: f32[256,256], index: 3, kind: input, shape index: {}]   ;;  %s568_s4 = inlined_call_operand.vmem [shape: f32[1,256], index: 4, kind: input, shape index: {}]   ;;  %s569_s5 = inlined_call_operand.hbm [shape: f32[16,256], index: 5, kind: output, shape index: {}]  }
   0x1   :  { %11 = vsyncpa [#allocation6], 0 }
   0x2   :  { %12 = vsyncpa [#allocation4], 0  ;;  %s496_s18 = smov [#allocation5]  }
   0x3   :  { %s30_s19 = sshll.u32 %s496_s18, 4  ;;  %s31_s19 = int_to_ptr.vmem [resolvable:$true] %s30_s19 }
   0x4   :  { %s418_s20 = scalar_lea.vmem %s31_s19, 1024  ;;  %p423_p1 = scmp.lt.s32.totalorder %s31_s19, %s31_s19 }
   0x5   :  { %p419_p0 = scmp.ne.s32.totalorder %s31_s19, %s418_s20  ;;  %p424_p2 = scmp.lt.s32.totalorder %s418_s20, %s418_s20 }
   0x7   :  { %p425_p3 = por %p424_p2, %p423_p1 }
   0x9   :  { %p426_p4 = pnand %p425_p3, %p419_p0 }
   0xb   :  { %429 = shalt.err (!%p426_p4)
}
   0xc   :  { %s497_s21 = smov 256   ;;  %s498_s22 = smov 16  }
   0xd   :  { %36 = dma.hbm_to_vmem [thread:$0]  %s565_s1, 1024, %s31_s19, [#allocation6], %s497_s21, %s497_s21, %s498_s22  }
   0xe   :  { %s499_s25 = smov [#allocation2]  }
   0xf   :  { %s18_s26 = sshll.u32 %s499_s25, 4  ;;  %s19_s26 = int_to_ptr.vmem [resolvable:$true] %s18_s26 }
  0x10   :  { %s438_s27 = scalar_lea.vmem %s19_s26, 256  ;;  %p443_p6 = scmp.lt.s32.totalorder %s19_s26, %s19_s26 }
  0x11   :  { %p439_p5 = scmp.ne.s32.totalorder %s19_s26, %s438_s27  ;;  %p444_p7 = scmp.lt.s32.totalorder %s438_s27, %s438_s27 }
  0x13   :  { %p445_p8 = por %p444_p7, %p443_p6 }
  0x15   :  { %p446_p9 = pnand %p445_p8, %p439_p5 }
  0x17   :  { %449 = shalt.err (!%p446_p9)
}
  0x18   :  { %s500_s28 = smov 128   ;;  %s501_s29 = smov 8  }
  0x19   :  { %24 = dma.hbm_to_vmem [thread:$0]  %s564_s0, 256, %s19_s26, [#allocation3], %s500_s28, %s500_s28, %s501_s29  }
  0x1a   :  { %s502_s7 = smov [#allocation7]  }
  0x1b   :  { %s44_s8 = sshll.u32 %s502_s7, 4  ;;  %s45_s8 = int_to_ptr.vmem [resolvable:$true] %s44_s8 }
  0x1c   :  { %s458_s1 = scalar_lea.vmem %s45_s8, 8192  ;;  %p463_p11 = scmp.lt.s32.totalorder %s45_s8, %s45_s8 }
  0x1d   :  { %p459_p10 = scmp.ne.s32.totalorder %s45_s8, %s458_s1  ;;  %p464_p12 = scmp.lt.s32.totalorder %s458_s1, %s458_s1 }
  0x1f   :  { %p465_p13 = por %p464_p12, %p463_p11 }
  0x21   :  { %p466_p0 = pnand %p465_p13, %p459_p10 }
  0x23   :  { %469 = shalt.err (!%p466_p0)
}
  0x24   :  { %50 = dma.hbm_to_vmem [thread:$0]  %s567_s3, 8192, %s45_s8, [#allocation6], %s497_s21, %s497_s21, %s498_s22  }
  0x25   :  { %490 = dma.done.wait [#allocation3], 256  }
  0x26   :  { %491 = vsyncadd [#allocation3], 4294967040 }
  0x27   :  { %492 = dma.done.wait [#allocation6], 9216  }
  0x28   :  { %493 = vsyncadd [#allocation6], 4294958080  ;;  %v503_v0 = vmov 0.0   ;;  %v71_v1 = vld [vmem:[#allocation5 + $0x38] sm:$0xff]  ;;  %v70_v2 = vld [vmem:[#allocation5 + $0x30] sm:$0xff]  ;;  %vm84_vm0 = vcmask 261120  }
  0x29   :  { %155 = vmatprep.mubr.f32.mxu0 %v503_v0  ;;  %v69_v3 = vld [vmem:[#allocation5 + $0x28] sm:$0xff]  ;;  %115 = vmatprep.subr.mxu0 %v71_v1  ;;  %v68_v4 = vld [vmem:[#allocation5 + $0x20] sm:$0xff]  ;;  %v67_v5 = vld [vmem:[#allocation5 + $0x18] sm:$0xff] }
  0x2a   :  { %116 = vmatpush1.msra.mxu0 %v70_v2  ;;  %v66_v6 = vld [vmem:[#allocation5 + $0x10] sm:$0xff]  ;;  %v219_v7 = vld [vmem:[#allocation7 + $0xf8] sm:$0xff]  ;;  %v65_v9 = vld [vmem:[#allocation5 + $0x8] sm:$0xff] }
  0x2b   :  { %117 = vmatprep.subr.mxu0 %v69_v3  ;;  %v218_v8 = vld [vmem:[#allocation7 + $0xf0] sm:$0xff]  ;;  %264 = vmatprep.subr.mxu1 %v219_v7  ;;  %v217_v10 = vld [vmem:[#allocation7 + $0xe8] sm:$0xff]  ;;  %v216_v11 = vld [vmem:[#allocation7 + $0xe0] sm:$0xff] }
  0x2c   :  { %118 = vmatpush1.msra.mxu0 %v68_v4  ;;  %v64_v12 = vld [vmem:[#allocation5] sm:$0xff]  ;;  %265 = vmatpush1.msra.mxu1 %v218_v8  ;;  %v215_v13 = vld [vmem:[#allocation7 + $0xd8] sm:$0xff]  ;;  %v62_v14 = vld [vmem:[#allocation2] sm:$0xff] }
  0x2d   :  { %119 = vmatprep.subr.mxu0 %v67_v5  ;;  %266 = vmatprep.subr.mxu1 %v217_v10  ;;  %v214_v15 = vld [vmem:[#allocation7 + $0xd0] sm:$0xff]  ;;  %v213_v16 = vld [vmem:[#allocation7 + $0xc8] sm:$0xff]  ;;  %v212_v17 = vld [vmem:[#allocation7 + $0xc0] sm:$0xff] }
  0x2e   :  { %120 = vmatpush1.msra.mxu0 %v66_v6  ;;  %267 = vmatpush1.msra.mxu1 %v216_v11  ;;  %v211_v18 = vld [vmem:[#allocation7 + $0xb8] sm:$0xff]  ;;  %v210_v20 = vld [vmem:[#allocation7 + $0xb0] sm:$0xff]  ;;  %v209_v21 = vld [vmem:[#allocation7 + $0xa8] sm:$0xff]  ;;  %v74_v11 = vlaneseq }
  0x2f   :  { %121 = vmatprep.subr.mxu0 %v65_v9  ;;  %268 = vmatprep.subr.mxu1 %v215_v13  ;;  %v63_v19 = vld [vmem:[#allocation2 + $0x8] sm:$0xff]  ;;  %v208_v22 = vld [vmem:[#allocation7 + $0xa0] sm:$0xff]  ;;  %v206_v24 = vld [vmem:[#allocation7 + $0x90] sm:$0xff] }
  0x30   :  { %122 = vmatpush1.msra.mxu0 %v64_v12  ;;  %269 = vmatpush1.msra.mxu1 %v214_v15  ;;  %v207_v23 = vld [vmem:[#allocation7 + $0x98] sm:$0xff]  ;;  %v205_v25 = vld [vmem:[#allocation7 + $0x88] sm:$0xff]  ;;  %v204_v26 = vld [vmem:[#allocation7 + $0x80] sm:$0xff]  ;;  %v75_v12 = vshrl.u32 %v74_v11, 7 }
  0x31   :  { %383 = vmatmul.mubr.msk.f32.vlgmr.msra.gmra.mxu0 %vm84_vm0, %v62_v14  ;;  %270 = vmatprep.subr.mxu1 %v213_v16  ;;  %v203_v27 = vld [vmem:[#allocation7 + $0x78] sm:$0xff]  ;;  %v202_v28 = vld [vmem:[#allocation7 + $0x70] sm:$0xff]  ;;  %v201_v29 = vld [vmem:[#allocation7 + $0x68] sm:$0xff] }
  0x32   :  { %161 = vmatprep.mubr.f32.mxu0 %v503_v0  ;;  %271 = vmatpush1.msra.mxu1 %v212_v17  ;;  %v200_v30 = vld [vmem:[#allocation7 + $0x60] sm:$0xff]  ;;  %v199_v31 = vld [vmem:[#allocation7 + $0x58] sm:$0xff]  ;;  %v198_v32 = vld [vmem:[#allocation7 + $0x50] sm:$0xff]  ;;  %v76_v13 = vsub.s32 0, %v75_v12  ;;  %v80_v15 = vsub.s32 1, %v75_v12 }
  0x33   :  { %272 = vmatprep.subr.mxu1 %v211_v18  ;;  %v197_v33 = vld [vmem:[#allocation7 + $0x48] sm:$0xff]  ;;  %v196_v34 = vld [vmem:[#allocation7 + $0x40] sm:$0xff]  ;;  %v195_v35 = vld [vmem:[#allocation7 + $0x38] sm:$0xff] }
  0x34   :  { %273 = vmatpush1.msra.mxu1 %v210_v20  ;;  %v194_v36 = vld [vmem:[#allocation7 + $0x30] sm:$0xff]  ;;  %v193_v37 = vld [vmem:[#allocation7 + $0x28] sm:$0xff]  ;;  %v192_v38 = vld [vmem:[#allocation7 + $0x20] sm:$0xff] }
  0x35   :  { %384 = vmatmul.mubr.msk.f32.gmra.mxu0 %vm84_vm0, %v63_v19  ;;  %274 = vmatprep.subr.mxu1 %v209_v21  ;;  %v191_v39 = vld [vmem:[#allocation7 + $0x18] sm:$0xff]  ;;  %v190_v40 = vld [vmem:[#allocation7 + $0x10] sm:$0xff]  ;;  %v189_v41 = vld [vmem:[#allocation7 + $0x8] sm:$0xff] }
  0x36   :  { %275 = vmatpush1.msra.mxu1 %v208_v22  ;;  %v188_v42 = vld [vmem:[#allocation7] sm:$0xff]  ;;  %v251_v43 = vld [vmem:[#allocation7 + $0x1f8] sm:$0xff]  ;;  %v250_v44 = vld [vmem:[#allocation7 + $0x1f0] sm:$0xff] }
  0x37   :  { %276 = vmatprep.subr.mxu1 %v207_v23  ;;  %v249_v45 = vld [vmem:[#allocation7 + $0x1e8] sm:$0xff]  ;;  %v248_v46 = vld [vmem:[#allocation7 + $0x1e0] sm:$0xff]  ;;  %v247_v47 = vld [vmem:[#allocation7 + $0x1d8] sm:$0xff] }
  0x38   :  { %277 = vmatpush1.msra.mxu1 %v206_v24  ;;  %v246_v48 = vld [vmem:[#allocation7 + $0x1d0] sm:$0xff]  ;;  %v245_v49 = vld [vmem:[#allocation7 + $0x1c8] sm:$0xff]  ;;  %v244_v50 = vld [vmem:[#allocation7 + $0x1c0] sm:$0xff] }
  0x39   :  { %278 = vmatprep.subr.mxu1 %v205_v25  ;;  %v243_v51 = vld [vmem:[#allocation7 + $0x1b8] sm:$0xff]  ;;  %v242_v52 = vld [vmem:[#allocation7 + $0x1b0] sm:$0xff]  ;;  %v241_v53 = vld [vmem:[#allocation7 + $0x1a8] sm:$0xff] }
  0x3a   :  { %279 = vmatpush1.msra.mxu1 %v204_v26  ;;  %v240_v54 = vld [vmem:[#allocation7 + $0x1a0] sm:$0xff]  ;;  %v239_v55 = vld [vmem:[#allocation7 + $0x198] sm:$0xff]  ;;  %v238_v56 = vld [vmem:[#allocation7 + $0x190] sm:$0xff] }
  0x3b   :  { %280 = vmatprep.subr.mxu1 %v203_v27  ;;  %v237_v57 = vld [vmem:[#allocation7 + $0x188] sm:$0xff]  ;;  %v236_v58 = vld [vmem:[#allocation7 + $0x180] sm:$0xff]  ;;  %v235_v59 = vld [vmem:[#allocation7 + $0x178] sm:$0xff] }
  0x3c   :  { %281 = vmatpush1.msra.mxu1 %v202_v28  ;;  %v234_v60 = vld [vmem:[#allocation7 + $0x170] sm:$0xff]  ;;  %v233_v61 = vld [vmem:[#allocation7 + $0x168] sm:$0xff]  ;;  %v232_v62 = vld [vmem:[#allocation7 + $0x160] sm:$0xff] }
  0x3d   :  { %282 = vmatprep.subr.mxu1 %v201_v29  ;;  %v231_v63 = vld [vmem:[#allocation7 + $0x158] sm:$0xff]  ;;  %v230_v0 = vld [vmem:[#allocation7 + $0x150] sm:$0xff]  ;;  %v229_v1 = vld [vmem:[#allocation7 + $0x148] sm:$0xff] }
  0x3e   :  { %283 = vmatpush1.msra.mxu1 %v200_v30  ;;  %v228_v2 = vld [vmem:[#allocation7 + $0x140] sm:$0xff]  ;;  %v227_v3 = vld [vmem:[#allocation7 + $0x138] sm:$0xff]  ;;  %v226_v4 = vld [vmem:[#allocation7 + $0x130] sm:$0xff] }
  0x3f   :  { %284 = vmatprep.subr.mxu1 %v199_v31  ;;  %v225_v5 = vld [vmem:[#allocation7 + $0x128] sm:$0xff]  ;;  %v224_v6 = vld [vmem:[#allocation7 + $0x120] sm:$0xff]  ;;  %v223_v7 = vld [vmem:[#allocation7 + $0x118] sm:$0xff] }
  0x40   :  { %285 = vmatpush1.msra.mxu1 %v198_v32  ;;  %v222_v8 = vld [vmem:[#allocation7 + $0x110] sm:$0xff]  ;;  %v221_v9 = vld [vmem:[#allocation7 + $0x108] sm:$0xff]  ;;  %v220_v10 = vld [vmem:[#allocation7 + $0x100] sm:$0xff] }
  0x41   :  { %286 = vmatprep.subr.mxu1 %v197_v33  ;;  %v72_v14 = vld [vmem:[%s566_s2] sm:$0x3] }
  0x42   :  { %287 = vmatpush1.msra.mxu1 %v196_v34  ;;  %v77_v16 = vrot.slane %v72_v14, %v76_v13  ;;  %v81_v17 = vrot.slane %v72_v14, %v80_v15 }
  0x43   :  { %288 = vmatprep.subr.mxu1 %v195_v35 }
  0x44   :  { %289 = vmatpush1.msra.mxu1 %v194_v36 }
  0x45   :  { %290 = vmatprep.subr.mxu1 %v193_v37 }
  0x46   :  { %291 = vmatpush1.msra.mxu1 %v192_v38 }
  0x47   :  { %292 = vmatprep.subr.mxu1 %v191_v39 }
  0x48   :  { %293 = vmatpush1.msra.mxu1 %v190_v40 }
  0x49   :  { %294 = vmatprep.subr.mxu1 %v189_v41 }
  0x4a   :  { %295 = vmatpush1.msra.mxu1 %v188_v42 }
  0x4b   :  { %296 = vmatprep.subr.mxu1 %v251_v43 }
  0x4c   :  { %297 = vmatpush2.msra.mxu1 %v250_v44 }
  0x4d   :  { %298 = vmatprep.subr.mxu1 %v249_v45 }
  0x4e   :  { %299 = vmatpush2.msra.mxu1 %v248_v46  ;;  %v252_v46 = vld [vmem:[%s568_s4] sm:$0x3]  ;;  %s504_s4 = smov [#allocation8]  }
  0x4f   :  { %300 = vmatprep.subr.mxu1 %v247_v47  ;;  %v257_v47 = vrot.slane %v252_v46, %v76_v13  ;;  %s370_s12 = sshll.u32 %s504_s4, 4  ;;  %s371_s12 = int_to_ptr.vmem [resolvable:$true] %s370_s12 }
  0x50   :  { %301 = vmatpush2.msra.mxu1 %v246_v48  ;;  %v261_v48 = vrot.slane %v252_v46, %v80_v15  ;;  %s470_s13 = scalar_lea.vmem %s371_s12, 512  ;;  %p475_p2 = scmp.lt.s32.totalorder %s371_s12, %s371_s12 }
  0x51   :  { %302 = vmatprep.subr.mxu1 %v245_v49  ;;  %p471_p1 = scmp.ne.s32.totalorder %s371_s12, %s470_s13  ;;  %p476_p3 = scmp.lt.s32.totalorder %s470_s13, %s470_s13 }
  0x52   :  { %303 = vmatpush2.msra.mxu1 %v244_v50 }
  0x53   :  { %304 = vmatprep.subr.mxu1 %v243_v51  ;;  %p477_p4 = por %p476_p3, %p475_p2 }
  0x54   :  { %305 = vmatpush2.msra.mxu1 %v242_v52 }
  0x55   :  { %306 = vmatprep.subr.mxu1 %v241_v53  ;;  %p478_p5 = pnand %p477_p4, %p471_p1 }
  0x56   :  { %307 = vmatpush2.msra.mxu1 %v240_v54 }
  0x57   :  { %308 = vmatprep.subr.mxu1 %v239_v55 }
  0x58   :  { %309 = vmatpush2.msra.mxu1 %v238_v56 }
  0x59   :  { %310 = vmatprep.subr.mxu1 %v237_v57 }
  0x5a   :  { %311 = vmatpush2.msra.mxu1 %v236_v58 }
  0x5b   :  { %312 = vmatprep.subr.mxu1 %v235_v59 }
  0x5c   :  { %313 = vmatpush2.msra.mxu1 %v234_v60 }
  0x5d   :  { %314 = vmatprep.subr.mxu1 %v233_v61 }
  0x5e   :  { %315 = vmatpush2.msra.mxu1 %v232_v62 }
  0x5f   :  { %316 = vmatprep.subr.mxu1 %v231_v63 }
  0x60   :  { %317 = vmatpush2.msra.mxu1 %v230_v0 }
  0x61   :  { %318 = vmatprep.subr.mxu1 %v229_v1 }
  0x62   :  { %319 = vmatpush2.msra.mxu1 %v228_v2 }
  0x63   :  { %320 = vmatprep.subr.mxu1 %v227_v3 }
  0x64   :  { %321 = vmatpush2.msra.mxu1 %v226_v4 }
  0x65   :  { %322 = vmatprep.subr.mxu1 %v225_v5 }
  0x66   :  { %323 = vmatpush2.msra.mxu1 %v224_v6 }
  0x67   :  { %324 = vmatprep.subr.mxu1 %v223_v7 }
  0x68   :  { %325 = vmatpush2.msra.mxu1 %v222_v8 }
  0x69   :  { %326 = vmatprep.subr.mxu1 %v221_v9 }
  0x6a   :  { %327 = vmatpush2.msra.mxu1 %v220_v10 }
  0xf1   :  { %v157_v18 = vpop.f32.mrf.mxu0 }
  0xf2   :  { %v158_v19 = vadd.f32 %v157_v18, %v77_v16 }
  0xf3   :  { %v159_v20 = vpop.f32.mrf.mxu0 }
  0xf4   :  { %v172_v21 = vmul.f32 0.70710677, %v158_v19  ;;  %v160_v22 = vadd.f32 %v159_v20, %v81_v17  ;;  %v168_v36 = vmul.f32 0.5, %v158_v19 }
  0xf5   :  { %v163_v23 = vpop.f32.mrf.mxu0 }
  0xf6   :  { %394 = verf.f32 %v172_v21  ;;  %v173_v24 = vmul.f32 0.70710677, %v160_v22  ;;  %v164_v25 = vadd.f32 %v163_v23, %v77_v16  ;;  %v169_v33 = vmul.f32 0.5, %v160_v22 }
  0xf7   :  { %v165_v26 = vpop.f32.mrf.mxu0 }
  0xf8   :  { %396 = verf.f32 %v173_v24  ;;  %v174_v27 = vmul.f32 0.70710677, %v164_v25  ;;  %v166_v28 = vadd.f32 %v165_v26, %v81_v17  ;;  %v170_v43 = vmul.f32 0.5, %v164_v25 }
  0xfa   :  { %398 = verf.f32 %v174_v27  ;;  %v175_v29 = vmul.f32 0.70710677, %v166_v28  ;;  %v171_v41 = vmul.f32 0.5, %v166_v28 }
  0xfc   :  { %400 = verf.f32 %v175_v29 }
 0x103   :  { %v395_v30 = vpop.eup %394 }
 0x104   :  { %v180_v32 = vadd.f32 1.0, %v395_v30 }
 0x105   :  { %v397_v31 = vpop.eup %396 }
 0x106   :  { %v181_v34 = vadd.f32 1.0, %v397_v31  ;;  %v184_v39 = vmul.f32 %v180_v32, %v168_v36 }
 0x107   :  { %v399_v35 = vpop.eup %398 }
 0x108   :  { %v185_v37 = vmul.f32 %v181_v34, %v169_v33  ;;  %v182_v40 = vadd.f32 1.0, %v399_v35 }
 0x109   :  { %v401_v38 = vpop.eup %400 }
 0x10a   :  { %328 = vmatprep.mubr.f32.mxu1 %v185_v37  ;;  %v183_v42 = vadd.f32 1.0, %v401_v38  ;;  %v186_v45 = vmul.f32 %v182_v40, %v170_v43 }
 0x10b   :  { %329 = vmatmul.mubr.f32.vlgmr.msra.gmra.mxu1 %v184_v39 }
 0x10c   :  { %v187_v44 = vmul.f32 %v183_v42, %v171_v41 }
 0x10e   :  { %334 = vmatprep.mubr.f32.mxu1 %v187_v44 }
 0x10f   :  { %335 = vmatmul.mubr.f32.gmra.mxu1 %v186_v45 }
 0x1cb   :  { %v330_v49 = vpop.f32.mrf.mxu1 }
 0x1cc   :  { %v331_v50 = vadd.f32 %v330_v49, %v257_v47 }
 0x1cd   :  { %v332_v51 = vpop.f32.mrf.mxu1 }
 0x1ce   :  { %v345_v52 = vmul.f32 0.70710677, %v331_v50  ;;  %v333_v53 = vadd.f32 %v332_v51, %v261_v48  ;;  %v341_v62 = vmul.f32 0.5, %v331_v50 }
 0x1cf   :  { %v336_v54 = vpop.f32.mrf.mxu1 }
 0x1d0   :  { %402 = verf.f32 %v345_v52  ;;  %v346_v55 = vmul.f32 0.70710677, %v333_v53  ;;  %v337_v56 = vadd.f32 %v336_v54, %v257_v47  ;;  %v342_v2 = vmul.f32 0.5, %v333_v53 }
 0x1d1   :  { %v338_v57 = vpop.f32.mrf.mxu1 }
 0x1d2   :  { %404 = verf.f32 %v346_v55  ;;  %v347_v58 = vmul.f32 0.70710677, %v337_v56  ;;  %v339_v59 = vadd.f32 %v338_v57, %v261_v48  ;;  %v343_v6 = vmul.f32 0.5, %v337_v56 }
 0x1d4   :  { %406 = verf.f32 %v347_v58  ;;  %v348_v60 = vmul.f32 0.70710677, %v339_v59  ;;  %v344_v10 = vmul.f32 0.5, %v339_v59 }
 0x1d6   :  { %408 = verf.f32 %v348_v60 }
 0x1dd   :  { %v403_v61 = vpop.eup %402 }
 0x1de   :  { %v353_v63 = vadd.f32 1.0, %v403_v61 }
 0x1df   :  { %v405_v0 = vpop.eup %404 }
 0x1e0   :  { %v357_v1 = vmul.f32 %v353_v63, %v341_v62  ;;  %v354_v3 = vadd.f32 1.0, %v405_v0 }
 0x1e1   :  { %v407_v4 = vpop.eup %406 }
 0x1e2   :  { %361 = vst [vmem:[#allocation8] sm:$0xff] %v357_v1  ;;  %v358_v5 = vmul.f32 %v354_v3, %v342_v2  ;;  %v355_v7 = vadd.f32 1.0, %v407_v4 }
 0x1e3   :  { %v409_v8 = vpop.eup %408 }
 0x1e4   :  { %362 = vst [vmem:[#allocation8 + $0x8] sm:$0xff] %v358_v5  ;;  %v359_v9 = vmul.f32 %v355_v7, %v343_v6  ;;  %v356_v11 = vadd.f32 1.0, %v409_v8 }
 0x1e6   :  { %363 = vst [vmem:[#allocation8 + $0x10] sm:$0xff] %v359_v9  ;;  %v360_v12 = vmul.f32 %v356_v11, %v344_v10 }
 0x1e8   :  { %364 = vst [vmem:[#allocation8 + $0x18] sm:$0xff] %v360_v12 }
 0x1e9   :  { %481 = shalt.err (!%p478_p5)
}
 0x1ea   :  { %376 = dma.vmem_to_hbm [thread:$0]  %s371_s12, 512, %s569_s5, [#allocation4], %s497_s21, %s497_s21, %s498_s22  }
 0x1eb   :  { %494 = dma.done.wait [#allocation4], 512  }
 0x1ec   :  { %495 = vsyncadd [#allocation4], 4294966784 }
 0x1ed   :  { %380 = vsyncpa [#allocation3], 1 }
 0x1ee   :  { %381 = vsyncpa [#allocation6], 1 }
 0x1ef   :  { %382 = vsyncpa [#allocation4], 1 }

</bundles_post_ra>
